<compile_context>
chip_gen: v5e
topology: v5e:2x2
jax: 0.10.0
libtpu: 0.0.40
codegen_flags: <defaults>
</compile_context>

<pallas_src>
import jax
import jax.numpy as jnp
from jax.experimental import pallas as pl
from jax.experimental.pallas import tpu as pltpu


def _round_up(x: int, m: int) -> int:
    return (x + m - 1) // m * m


def _vmem_budget() -> int:
    """~85% of physical VMEM (generation-aware); conservative fallback."""
    cap = 64 * 1024 * 1024
    try:
        info = pltpu.get_tpu_info()
        cap = int(getattr(info, "vmem_capacity_bytes", cap))
    except Exception:
        pass
    return int(cap * 0.85)


def _swiglu_kernel(x_ref, w12_ref, b12_ref, w3_ref, b3_ref, o_ref, acc_ref):
    h = pl.program_id(1)
    th = w3_ref.shape[0]  # hidden tile size (static)

    @pl.when(h == 0)
    def _():
        acc_ref[...] = jnp.zeros_like(acc_ref)

    # One fused MXU dot: x [tm, D_in] @ W12 chunk [D_in, 2*th] -> f32 [tm, 2*th]
    z = jnp.dot(x_ref[...], w12_ref[...],
                preferred_element_type=jnp.float32) + b12_ref[...]
    x1 = z[:, :th]          # gate half   (128-aligned lane slice)
    x2 = z[:, th:]          # value half
    g = (x1 * jax.nn.sigmoid(x1)) * x2          # SiLU(x1) * x2 in f32

    # Accumulate output projection over hidden chunks in f32.
    acc_ref[...] += jnp.dot(g.astype(w3_ref.dtype), w3_ref[...],
                            preferred_element_type=jnp.float32)

    @pl.when(h == pl.num_programs(1) - 1)
    def _():
        o_ref[...] = (acc_ref[...] + b3_ref[...]).astype(o_ref.dtype)


def prepare_swiglu_params(w12, b12, w3, b3, *, tm=256, h_tile=None):
    """Pad/transpose/cast the weights once (cache & reuse across forwards).

    w12: [2H, D_in], b12: [2H]  (nn.Linear(in_features, 2*hidden))
    w3:  [D_out, H], b3: [D_out] (nn.Linear(hidden, out_features))
    """
    two_h, d_in = w12.shape
    hidden = two_h // 2
    d_out = w3.shape[0]

    d_in_p = _round_up(d_in, 128)
    h_p = _round_up(hidden, 128)
    d_out_p = _round_up(d_out, 128)

    budget = _vmem_budget()
    tm_b = _round_up(max(int(tm), 128), 128)

    def fp(tm_, th_, wbuf):
        return (
            2 * tm_ * d_in_p * 2                 # x tile (bf16), double-buffered
            + wbuf * d_in_p * (2 * th_) * 2      # fused W12 chunk (bf16)
            + wbuf * th_ * d_out_p * 2           # W3 chunk (bf16)
            + wbuf * 8 * (2 * th_) * 4           # b12 chunk (f32, 8-sublane pad)
            + 8 * d_out_p * 4                    # b3 (single-buffered)
            + 2 * tm_ * d_out_p * 4              # out tile, double-buffered
            + tm_ * d_out_p * 4                  # f32 accumulator scratch
            + 5 * tm_ * th_ * 4                  # z / x1 / x2 / g f32 temps
            + tm_ * d_out_p * 4                  # f32 dot output temp
        )

    # Choose the hidden tile: full H (single step, single-buffered weights) if
    # it fits the VMEM budget, otherwise halve down to multiples of 128.
    th = h_p
    if h_tile is not None:
        th = min(th, _round_up(max(int(h_tile), 128), 128))
    if fp(tm_b, th, 1 if th == h_p else 2) > budget:
        while th > 128 and fp(tm_b, th, 2) > budget:
            th = max(128, _round_up(th // 2, 128))
    h_pp = _round_up(h_p, th)
    n_h = h_pp // th

    mxu = jnp.bfloat16
    w1p = jnp.zeros((d_in_p, h_pp), mxu).at[:d_in, :hidden].set(
        w12[:hidden].T.astype(mxu))
    w2p = jnp.zeros((d_in_p, h_pp), mxu).at[:d_in, :hidden].set(
        w12[hidden:].T.astype(mxu))
    # Interleave per hidden tile as [gate(th) | value(th)] so one dot per grid
    # step yields [tm, 2*th] and the x1/x2 split is a tile-aligned lane slice.
    w12f = jnp.concatenate(
        [w1p.reshape(d_in_p, n_h, th), w2p.reshape(d_in_p, n_h, th)], axis=-1
    ).reshape(d_in_p, 2 * h_pp)

    b1p = jnp.zeros((h_pp,), jnp.float32).at[:hidden].set(
        b12[:hidden].astype(jnp.float32))
    b2p = jnp.zeros((h_pp,), jnp.float32).at[:hidden].set(
        b12[hidden:].astype(jnp.float32))
    b12f = jnp.concatenate(
        [b1p.reshape(n_h, th), b2p.reshape(n_h, th)], axis=-1
    ).reshape(1, 2 * h_pp)

    w3t = jnp.zeros((h_pp, d_out_p), mxu).at[:hidden, :d_out].set(
        w3.T.astype(mxu))
    b3r = jnp.zeros((1, d_out_p), jnp.float32).at[0, :d_out].set(
        b3.astype(jnp.float32))

    return dict(w12f=w12f, b12f=b12f, w3t=w3t, b3r=b3r,
                d_in=d_in, d_in_p=d_in_p, hidden=hidden,
                h_pp=h_pp, th=th, n_h=n_h, d_out=d_out, d_out_p=d_out_p)


def swiglu_ffn_apply(x, params, *, tm=256):
    d_in, d_in_p = params["d_in"], params["d_in_p"]
    th, n_h = params["th"], params["n_h"]
    d_out, d_out_p = params["d_out"], params["d_out_p"]
    out_dtype = x.dtype

    x2d = x.reshape(-1, d_in)
    n_tok = x2d.shape[0]

    tm_req = _round_up(max(int(tm), 128), 128)
    if n_tok >= 256:
        # Guarantee >= 2 token-grid steps so the "parallel" axis spans both
        # v7x TensorCores.
        tm_eff = min(tm_req, _round_up(-(-n_tok // 2), 128))
    else:
        tm_eff = min(tm_req, _round_up(n_tok, 128))
    n_pad = _round_up(n_tok, tm_eff)

    mxu = jnp.bfloat16
    if n_pad == n_tok and d_in == d_in_p:
        x_p = x2d.astype(mxu)                       # no pad copy needed
    else:
        x_p = jnp.zeros((n_pad, d_in_p), mxu).at[:n_tok, :d_in].set(
            x2d.astype(mxu))

    single_w = (n_h == 1)

    def wspec(shape, index_map):
        # Constant-index weight/bias blocks only need one VMEM buffer; with
        # H-tiling (n_h > 1) keep default double-buffering so chunk DMAs hide
        # behind the MXU.
        if single_w:
            return pl.BlockSpec(shape, index_map, pipeline_mode=pl.Buffered(1))
        return pl.BlockSpec(shape, index_map)

    out_p = pl.pallas_call(
        _swiglu_kernel,
        out_shape=jax.ShapeDtypeStruct((n_pad, d_out_p), out_dtype),
        grid_spec=pltpu.PrefetchScalarGridSpec(
            num_scalar_prefetch=0,
            grid=(n_pad // tm_eff, n_h),
            in_specs=[
                pl.BlockSpec((tm_eff, d_in_p), lambda i, h: (i, 0)),    # x tile
                wspec((d_in_p, 2 * th), lambda i, h: (0, h)),           # W12 chunk
                wspec((1, 2 * th), lambda i, h: (0, h)),                # b12 chunk
                wspec((th, d_out_p), lambda i, h: (h, 0)),              # W3 chunk
                pl.BlockSpec((1, d_out_p), lambda i, h: (0, 0),
                             pipeline_mode=pl.Buffered(1)),             # b3
            ],
            out_specs=pl.BlockSpec((tm_eff, d_out_p), lambda i, h: (i, 0)),
            scratch_shapes=[pltpu.VMEM((tm_eff, d_out_p), jnp.float32)],
        ),
        compiler_params=pltpu.CompilerParams(
            dimension_semantics=("parallel", "arbitrary"),
            vmem_limit_bytes=_vmem_budget(),
        ),
    )(x_p, params["w12f"], params["b12f"], params["w3t"], params["b3r"])

    if n_pad == n_tok and d_out == d_out_p:
        out2d = out_p
    else:
        out2d = out_p[:n_tok, :d_out]
    return out2d.reshape(*x.shape[:-1], d_out)


def swiglu_ffn(x, w12, b12, w3, b3, *, tm=256, h_tile=None):
    """Convenience wrapper (prep + apply). For best perf, call
    prepare_swiglu_params once at init and reuse it per forward."""
    params = prepare_swiglu_params(w12, b12, w3, b3, tm=tm, h_tile=h_tile)
    return swiglu_ffn_apply(x, params, tm=tm)


def _bf16_round(a):
    return a.astype(jnp.bfloat16).astype(jnp.float32)


def _ref_bf16(x, w12, b12, w3, b3, hidden):
    """Reference with the same bf16 rounding of MXU operands (f32 accum)."""
    xr = _bf16_round(x)
    h1 = xr @ _bf16_round(w12[:hidden].T) + b12[:hidden]
    h2 = xr @ _bf16_round(w12[hidden:].T) + b12[hidden:]
    g = jax.nn.silu(h1) * h2
    return _bf16_round(g) @ _bf16_round(w3.T) + b3


if __name__ == "__main__":
    key = jax.random.PRNGKey(0)

    # ---- Test 1: tiny shapes, single H step (single-buffered weights). ----
    batch, seq, in_features = 2, 8, 32
    hidden_features, out_features = 64, in_features

    k_x, k_w12, k_b12, k_w3, k_b3, key = jax.random.split(key, 6)
    x = jax.random.normal(k_x, (batch, seq, in_features), dtype=jnp.float32)
    w12 = jax.random.normal(k_w12, (2 * hidden_features, in_features),
                            dtype=jnp.float32) * 0.05
    b12 = jax.random.normal(k_b12, (2 * hidden_features,), dtype=jnp.float32) * 0.05
    w3 = jax.random.normal(k_w3, (out_features, hidden_features),
                           dtype=jnp.float32) * 0.05
    b3 = jax.random.normal(k_b3, (out_features,), dtype=jnp.float32) * 0.05

    out = jax.block_until_ready(swiglu_ffn(x, w12, b12, w3, b3))
    assert out.shape == (batch, seq, out_features)

    ref = _ref_bf16(x, w12, b12, w3, b3, hidden_features)
    assert jnp.allclose(out, ref, atol=2e-3, rtol=2e-3), "test1: mismatch vs bf16 ref"

    hf = x @ w12.T + b12
    x1f, x2f = jnp.split(hf, 2, axis=-1)
    ref_f32 = (jax.nn.silu(x1f) * x2f) @ w3.T + b3
    assert jnp.allclose(out, ref_f32, atol=5e-2, rtol=5e-2), "test1: mismatch vs f32 ref"

    # ---- Test 2: aligned shapes + forced H-tiling (accumulator path). ----
    batch2, seq2, in2 = 16, 8, 128
    hidden2, out2_f = 256, 128

    k_x, k_w12, k_b12, k_w3, k_b3, key = jax.random.split(key, 6)
    x2 = jax.random.normal(k_x, (batch2, seq2, in2), dtype=jnp.float32)
    w12_2 = jax.random.normal(k_w12, (2 * hidden2, in2), dtype=jnp.float32) * 0.05
    b12_2 = jax.random.normal(k_b12, (2 * hidden2,), dtype=jnp.float32) * 0.05
    w3_2 = jax.random.normal(k_w3, (out2_f, hidden2), dtype=jnp.float32) * 0.05
    b3_2 = jax.random.normal(k_b3, (out2_f,), dtype=jnp.float32) * 0.05

    params2 = prepare_swiglu_params(w12_2, b12_2, w3_2, b3_2, h_tile=128)
    assert params2["n_h"] == 2  # exercises the H-reduction / accumulator path
    out2 = jax.block_until_ready(swiglu_ffn_apply(x2, params2))
    assert out2.shape == (batch2, seq2, out2_f)

    ref2 = _ref_bf16(x2, w12_2, b12_2, w3_2, b3_2, hidden2)
    assert jnp.allclose(out2, ref2, atol=3e-3, rtol=3e-3), "test2: mismatch vs bf16 ref"

    print("KERNEL_OK")
</pallas_src>

<mosaic_0001>
module attributes {stable_mosaic.version = 11 : i64} {
  func.func @_swiglu_kernel(%arg0: i32, %arg1: i32, %arg2: memref<128x128xbf16, #tpu.memory_space<vmem>>, %arg3: memref<128x256xbf16, #tpu.memory_space<vmem>>, %arg4: memref<1x256xf32, #tpu.memory_space<vmem>>, %arg5: memref<128x128xbf16, #tpu.memory_space<vmem>>, %arg6: memref<1x128xf32, #tpu.memory_space<vmem>>, %arg7: memref<128x128xf32, #tpu.memory_space<vmem>>, %arg8: memref<128x128xf32, #tpu.memory_space<vmem>>) attributes {dimension_semantics = [#tpu.dimension_semantics<parallel>, #tpu.dimension_semantics<arbitrary>], iteration_bounds = array<i64: 1, 1>, scalar_prefetch = 0 : i64, scratch_operands = 1 : i64, tpu.core_type = #tpu.core_type<tc>, window_params = [{transform_indices = @transform_0, window_bounds = array<i64: 128, 128>}, {pipeline_mode = #tpu.pipeline_mode<synchronous>, transform_indices = @transform_1, window_bounds = array<i64: 128, 256>}, {pipeline_mode = #tpu.pipeline_mode<synchronous>, transform_indices = @transform_2, window_bounds = array<i64: 1, 256>}, {pipeline_mode = #tpu.pipeline_mode<synchronous>, transform_indices = @transform_3, window_bounds = array<i64: 128, 128>}, {pipeline_mode = #tpu.pipeline_mode<synchronous>, transform_indices = @transform_4, window_bounds = array<i64: 1, 128>}, {transform_indices = @transform_5, window_bounds = array<i64: 128, 128>}]} {
    %c0_i32 = arith.constant 0 : i32
    %0 = arith.cmpi eq, %arg1, %c0_i32 : i32
    %1 = arith.extui %0 : i1 to i32
    %c0_i32_0 = arith.constant 0 : i32
    %2 = arith.cmpi ne, %1, %c0_i32_0 : i32
    scf.if %2 {
      %cst_16 = arith.constant 0.000000e+00 : f32
      %27 = vector.broadcast %cst_16 : f32 to vector<128x128xf32>
      %c0_17 = arith.constant 0 : index
      %c0_18 = arith.constant 0 : index
      %28 = vector.load %arg8[%c0_17, %c0_18] : memref<128x128xf32, #tpu.memory_space<vmem>>, vector<128x128xf32>
      tpu.vector_store %arg8[%c0_17, %c0_18], %27 {strides = array<i32>} : memref<128x128xf32, #tpu.memory_space<vmem>>, vector<128x128xf32>,
    } else {
    }
    %c0 = arith.constant 0 : index
    %c0_1 = arith.constant 0 : index
    %3 = vector.load %arg2[%c0, %c0_1] : memref<128x128xbf16, #tpu.memory_space<vmem>>, vector<128x128xbf16>
    %c0_2 = arith.constant 0 : index
    %c0_3 = arith.constant 0 : index
    %4 = vector.load %arg3[%c0_2, %c0_3] : memref<128x256xbf16, #tpu.memory_space<vmem>>, vector<128x256xbf16>
    %cst = arith.constant dense<0.000000e+00> : vector<128x256xf32>
    %5 = tpu.matmul %3, %4, %cst {dimension_numbers = #tpu.dot_dimension_numbers<[1], [0], [0], [1], [0, 0, 1, 1], [], []>} : vector<128x128xbf16>, vector<128x256xbf16>, vector<128x256xf32> -> vector<128x256xf32>
    %c0_4 = arith.constant 0 : index
    %c0_5 = arith.constant 0 : index
    %6 = vector.load %arg4[%c0_4, %c0_5] : memref<1x256xf32, #tpu.memory_space<vmem>>, vector<1x256xf32>
    %7 = vector.broadcast %6 : vector<1x256xf32> to vector<128x256xf32>
    %8 = arith.addf %5, %7 : vector<128x256xf32>
    %9 = vector.extract_strided_slice %8 {offsets = [0, 0], sizes = [128, 128], strides = [1, 1]} : vector<128x256xf32> to vector<128x128xf32>
    %10 = vector.extract_strided_slice %8 {offsets = [0, 128], sizes = [128, 128], strides = [1, 1]} : vector<128x256xf32> to vector<128x128xf32>
    %11 = arith.negf %9 : vector<128x128xf32>
    %12 = math.exp %11 : vector<128x128xf32>
    %cst_6 = arith.constant 1.000000e+00 : f32
    %13 = vector.broadcast %cst_6 : f32 to vector<128x128xf32>
    %14 = arith.addf %13, %12 : vector<128x128xf32>
    %15 = arith.divf %13, %14 : vector<128x128xf32>
    %16 = arith.mulf %9, %15 : vector<128x128xf32>
    %17 = arith.mulf %16, %10 : vector<128x128xf32>
    %c0_7 = arith.constant 0 : index
    %c0_8 = arith.constant 0 : index
    %18 = vector.load %arg8[%c0_7, %c0_8] : memref<128x128xf32, #tpu.memory_space<vmem>>, vector<128x128xf32>
    %19 = arith.truncf %17 : vector<128x128xf32> to vector<128x128xbf16>
    %c0_9 = arith.constant 0 : index
    %c0_10 = arith.constant 0 : index
    %20 = vector.load %arg5[%c0_9, %c0_10] : memref<128x128xbf16, #tpu.memory_space<vmem>>, vector<128x128xbf16>
    %cst_11 = arith.constant dense<0.000000e+00> : vector<128x128xf32>
    %21 = tpu.matmul %19, %20, %cst_11 {dimension_numbers = #tpu.dot_dimension_numbers<[1], [0], [0], [1], [0, 0, 1, 1], [], []>} : vector<128x128xbf16>, vector<128x128xbf16>, vector<128x128xf32> -> vector<128x128xf32>
    %22 = arith.addf %18, %21 : vector<128x128xf32>
    %c0_12 = arith.constant 0 : index
    %c0_13 = arith.constant 0 : index
    %23 = vector.load %arg8[%c0_12, %c0_13] : memref<128x128xf32, #tpu.memory_space<vmem>>, vector<128x128xf32>
    tpu.vector_store %arg8[%c0_12, %c0_13], %22 {strides = array<i32>} : memref<128x128xf32, #tpu.memory_space<vmem>>, vector<128x128xf32>,
    %c0_i32_14 = arith.constant 0 : i32
    %24 = arith.cmpi eq, %arg1, %c0_i32_14 : i32
    %25 = arith.extui %24 : i1 to i32
    %c0_i32_15 = arith.constant 0 : i32
    %26 = arith.cmpi ne, %25, %c0_i32_15 : i32
    scf.if %26 {
      %c0_16 = arith.constant 0 : index
      %c0_17 = arith.constant 0 : index
      %27 = vector.load %arg8[%c0_16, %c0_17] : memref<128x128xf32, #tpu.memory_space<vmem>>, vector<128x128xf32>
      %c0_18 = arith.constant 0 : index
      %c0_19 = arith.constant 0 : index
      %28 = vector.load %arg6[%c0_18, %c0_19] : memref<1x128xf32, #tpu.memory_space<vmem>>, vector<1x128xf32>
      %29 = vector.broadcast %28 : vector<1x128xf32> to vector<128x128xf32>
      %30 = arith.addf %27, %29 : vector<128x128xf32>
      %c0_20 = arith.constant 0 : index
      %c0_21 = arith.constant 0 : index
      %31 = vector.load %arg7[%c0_20, %c0_21] : memref<128x128xf32, #tpu.memory_space<vmem>>, vector<128x128xf32>
      tpu.vector_store %arg7[%c0_20, %c0_21], %30 {strides = array<i32>} : memref<128x128xf32, #tpu.memory_space<vmem>>, vector<128x128xf32>,
    } else {
    }
    return
  }
  func.func @transform_0(%arg0: i32, %arg1: i32) -> (i32, i32) {
    %c0_i32 = arith.constant 0 : i32
    %c0_i32_0 = arith.constant 0 : i32
    return %arg0, %c0_i32 : i32, i32
  }
  func.func @transform_1(%arg0: i32, %arg1: i32) -> (i32, i32) {
    %c0_i32 = arith.constant 0 : i32
    %c0_i32_0 = arith.constant 0 : i32
    return %c0_i32, %arg1 : i32, i32
  }
  func.func @transform_2(%arg0: i32, %arg1: i32) -> (i32, i32) {
    %c0_i32 = arith.constant 0 : i32
    %c0_i32_0 = arith.constant 0 : i32
    return %c0_i32, %arg1 : i32, i32
  }
  func.func @transform_3(%arg0: i32, %arg1: i32) -> (i32, i32) {
    %c0_i32 = arith.constant 0 : i32
    %c0_i32_0 = arith.constant 0 : i32
    return %arg1, %c0_i32 : i32, i32
  }
  func.func @transform_4(%arg0: i32, %arg1: i32) -> (i32, i32) {
    %c0_i32 = arith.constant 0 : i32
    %c0_i32_0 = arith.constant 0 : i32
    %c0_i32_1 = arith.constant 0 : i32
    return %c0_i32, %c0_i32_0 : i32, i32
  }
  func.func @transform_5(%arg0: i32, %arg1: i32) -> (i32, i32) {
    %c0_i32 = arith.constant 0 : i32
    %c0_i32_0 = arith.constant 0 : i32
    return %arg0, %c0_i32 : i32, i32
  }
}

</mosaic_0001>

<bundles_post_ra>
// kernel: tpu_custom_call.1
= control target key start
LH: loop header
LB: loop body
LE: loop exit
PB: predicated region body
PF: predicated region fallthrough
CT: control target
= control target key end

     0   :  { %10 = vsyncpa [#allocation4], 0  ;;  %s1780_s0 = inlined_call_operand.hbm [shape: bf16[128,128], index: 0, kind: input, shape index: {}]   ;;  %s1781_s1 = inlined_call_operand.hbm [shape: bf16[128,256], index: 1, kind: input, shape index: {}]   ;;  %s1782_s2 = inlined_call_operand.hbm [shape: f32[1,256], index: 2, kind: input, shape index: {}]   ;;  %s1783_s3 = inlined_call_operand.hbm [shape: bf16[128,128], index: 3, kind: input, shape index: {}]   ;;  %s1784_s4 = inlined_call_operand.vmem [shape: f32[1,128], index: 4, kind: input, shape index: {}]   ;;  %s1785_s5 = inlined_call_operand.hbm [shape: f32[128,128], index: 5, kind: output, shape index: {}]  }
   0x1   :  { %11 = vsyncpa [#allocation7], 0 }
   0x2   :  { %12 = vsyncpa [#allocation10], 0  ;;  %s31_s20 = sshll.u32 %s1781_s1, 4  ;;  %s32_s20 = int_to_ptr.hbm [resolvable:$true] %s31_s20 }
   0x3   :  { %13 = vsyncpa [#allocation5], 0  ;;  %s1349_s21 = smov [#allocation6]   ;;  %s18_s25 = sshll.u32 %s1780_s0, 4  ;;  %s19_s25 = int_to_ptr.hbm [resolvable:$true] %s18_s25 }
   0x4   :  { %s33_s22 = sshll.u32 %s1349_s21, 4  ;;  %s1350_s26 = smov 128   ;;  %s34_s22 = int_to_ptr.vmem [resolvable:$true] %s33_s22 }
   0x5   :  { %s1351_s27 = smov 8   ;;  %s1352_s28 = smov [#allocation3]  }
   0x6   :  { %39 = dma.hbm_to_vmem [thread:$0]  %s32_s20, 2048, %s34_s22, [#allocation7], %s1350_s26, %s1350_s26, %s1351_s27  }
   0x7   :  { %s20_s29 = sshll.u32 %s1352_s28, 4  ;;  %s1353_s1 = smov 64   ;;  %s21_s29 = int_to_ptr.vmem [resolvable:$true] %s20_s29 }
   0x8   :  { %s1354_s30 = smov 4   ;;  %s45_s8 = sshll.u32 %s1782_s2, 4  ;;  %s46_s8 = int_to_ptr.hbm [resolvable:$true] %s45_s8 }
   0x9   :  { %26 = dma.hbm_to_vmem [thread:$0]  %s19_s25, 1024, %s21_s29, [#allocation4], %s1353_s1, %s1353_s1, %s1354_s30  }
   0xa   :  { %s1355_s9 = smov [#allocation8]   ;;  %s55_s12 = sshll.u32 %s1783_s3, 4  ;;  %s56_s12 = int_to_ptr.hbm [resolvable:$true] %s55_s12 }
   0xb   :  { %s47_s0 = sshll.u32 %s1355_s9, 4  ;;  %s1356_s13 = smov [#allocation9]   ;;  %s48_s0 = int_to_ptr.vmem [resolvable:$true] %s47_s0 }
   0xc   :  { %50 = dma.hbm_to_vmem [thread:$0]  %s46_s8, 32, %s48_s0, [#allocation7]  }
   0xd   :  { %s57_s14 = sshll.u32 %s1356_s13, 4  ;;  %s58_s14 = int_to_ptr.vmem [resolvable:$true] %s57_s14 }
   0xe   :  { %63 = dma.hbm_to_vmem [thread:$0]  %s56_s12, 1024, %s58_s14, [#allocation10], %s1353_s1, %s1353_s1, %s1354_s30  }
   0xf   :  { %1341 = dma.done.wait [#allocation4], 1024  }
  0x10   :  { %1342 = vsyncadd [#allocation4], 4294966272 }
  0x11   :  { %1343 = dma.done.wait [#allocation7], 2080  }
  0x12   :  { %1344 = vsyncadd [#allocation7], 4294965216 }
  0x13   :  { %1345 = dma.done.wait [#allocation10], 1024  }
  0x14   :  { %1346 = vsyncadd [#allocation10], 4294966272  ;;  %v1037_v0 = vld [vmem:[#allocation6 + $0x70] sm:$0xf]  ;;  %v1114_v1 = vld [vmem:[#allocation6 + $0x74] sm:$0xf0] }
  0x15   :  { %v1029_v2 = vld [vmem:[#allocation6 + $0x60] sm:$0xf]  ;;  %v1038_v3 = vor.u32 %v1114_v1, %v1037_v0  ;;  %v1112_v4 = vld [vmem:[#allocation6 + $0x64] sm:$0xf0]  ;;  %v1021_v6 = vld [vmem:[#allocation6 + $0x50] sm:$0xf] }
  0x16   :  { %v1030_v5 = vor.u32 %v1112_v4, %v1029_v2  ;;  %v1110_v7 = vld [vmem:[#allocation6 + $0x54] sm:$0xf0]  ;;  %v1113_v8 = vld [vmem:[#allocation6 + $0x74] sm:$0xf]  ;;  %v1039_v9 = vld [vmem:[#allocation6 + $0x78] sm:$0xf0] }
  0x17   :  { %268 = vmatpush.bf16.msra.mxu0 %v1038_v3  ;;  %1123 = vmatpush.bf16.msra.mxu3 %v1038_v3  ;;  %v1042_v10 = vor.u32 %v1113_v8, %v1039_v9  ;;  %v1111_v11 = vld [vmem:[#allocation6 + $0x64] sm:$0xf]  ;;  %v1031_v12 = vld [vmem:[#allocation6 + $0x68] sm:$0xf0]  ;;  %v1022_v13 = vor.u32 %v1110_v7, %v1021_v6  ;;  %v1013_v14 = vld [vmem:[#allocation6 + $0x40] sm:$0xf] }
  0x18   :  { %v1108_v15 = vld [vmem:[#allocation6 + $0x44] sm:$0xf0]  ;;  %v1034_v16 = vor.u32 %v1111_v11, %v1031_v12  ;;  %v1109_v17 = vld [vmem:[#allocation6 + $0x54] sm:$0xf]  ;;  %v1023_v18 = vld [vmem:[#allocation6 + $0x58] sm:$0xf0] }
  0x19   :  { %317 = vmatpush.bf16.msra.mxu1 %v1042_v10  ;;  %v1014_v19 = vor.u32 %v1108_v15, %v1013_v14  ;;  %v1005_v20 = vld [vmem:[#allocation6 + $0x30] sm:$0xf]  ;;  %v1106_v21 = vld [vmem:[#allocation6 + $0x34] sm:$0xf0]  ;;  %v1026_v22 = vor.u32 %v1109_v17, %v1023_v18  ;;  %v1107_v23 = vld [vmem:[#allocation6 + $0x44] sm:$0xf] }
  0x1a   :  { %v1015_v24 = vld [vmem:[#allocation6 + $0x48] sm:$0xf0]  ;;  %v1006_v25 = vor.u32 %v1106_v21, %v1005_v20  ;;  %v997_v26 = vld [vmem:[#allocation6 + $0x20] sm:$0xf]  ;;  %v1104_v27 = vld [vmem:[#allocation6 + $0x24] sm:$0xf0] }
  0x1b   :  { %269 = vmatpush.bf16.msra.mxu0 %v1030_v5  ;;  %1124 = vmatpush.bf16.msra.mxu3 %v1030_v5  ;;  %v1018_v28 = vor.u32 %v1107_v23, %v1015_v24  ;;  %v1105_v29 = vld [vmem:[#allocation6 + $0x34] sm:$0xf]  ;;  %v1007_v30 = vld [vmem:[#allocation6 + $0x38] sm:$0xf0]  ;;  %v998_v31 = vor.u32 %v1104_v27, %v997_v26  ;;  %v989_v32 = vld [vmem:[#allocation6 + $0x10] sm:$0xf] }
  0x1c   :  { %v1102_v33 = vld [vmem:[#allocation6 + $0x14] sm:$0xf0]  ;;  %v1010_v34 = vor.u32 %v1105_v29, %v1007_v30  ;;  %v1103_v35 = vld [vmem:[#allocation6 + $0x24] sm:$0xf]  ;;  %v999_v36 = vld [vmem:[#allocation6 + $0x28] sm:$0xf0] }
  0x1d   :  { %318 = vmatpush.bf16.msra.mxu1 %v1034_v16  ;;  %v990_v37 = vor.u32 %v1102_v33, %v989_v32  ;;  %v981_v38 = vld [vmem:[#allocation6] sm:$0xf]  ;;  %v1100_v39 = vld [vmem:[#allocation6 + $0x4] sm:$0xf0]  ;;  %v1002_v40 = vor.u32 %v1103_v35, %v999_v36  ;;  %v1101_v41 = vld [vmem:[#allocation6 + $0x14] sm:$0xf] }
  0x1e   :  { %v991_v42 = vld [vmem:[#allocation6 + $0x18] sm:$0xf0]  ;;  %v982_v43 = vor.u32 %v1100_v39, %v981_v38  ;;  %v1099_v45 = vld [vmem:[#allocation6 + $0x4] sm:$0xf]  ;;  %v983_v46 = vld [vmem:[#allocation6 + $0x8] sm:$0xf0] }
  0x1f   :  { %270 = vmatpush.bf16.msra.mxu0 %v1022_v13  ;;  %1125 = vmatpush.bf16.msra.mxu3 %v1022_v13  ;;  %v994_v44 = vor.u32 %v1101_v41, %v991_v42  ;;  %v1091_v47 = vld [vmem:[#allocation3] sm:$0xff]  ;;  %v1097_v48 = vld [vmem:[#allocation3 + $0x30] sm:$0xff]  ;;  %v986_v49 = vor.u32 %v1099_v45, %v983_v46  ;;  %v1092_v50 = vld [vmem:[#allocation3 + $0x8] sm:$0xff]  ;;  %s932_s18 = sshll.u32 %s1785_s5, 4  ;;  %s933_s18 = int_to_ptr.hbm [resolvable:$true] %s932_s18 }
  0x20   :  { %v1098_v51 = vld [vmem:[#allocation3 + $0x38] sm:$0xff]  ;;  %v1093_v52 = vld [vmem:[#allocation3 + $0x10] sm:$0xff]  ;;  %v1095_v54 = vld [vmem:[#allocation3 + $0x20] sm:$0xff] }
  0x21   :  { %319 = vmatpush.bf16.msra.mxu1 %v1026_v22  ;;  %v1094_v53 = vld [vmem:[#allocation3 + $0x18] sm:$0xff]  ;;  %v1096_v55 = vld [vmem:[#allocation3 + $0x28] sm:$0xff]  ;;  %v134_v59 = vld [vmem:[#allocation8] sm:$0x3] }
  0x22   :  { %v1122_v56 = vld [vmem:[#allocation9 + $0x38] sm:$0xff]  ;;  %v1121_v57 = vld [vmem:[#allocation9 + $0x30] sm:$0xff]  ;;  %v1120_v58 = vld [vmem:[#allocation9 + $0x28] sm:$0xff]  ;;  %v1403_v61 = vperm.slane %v134_v59, 0  ;;  %v1449_v39 = vperm.slane %v134_v59, 1 }
  0x23   :  { %271 = vmatpush.bf16.msra.mxu0 %v1014_v19  ;;  %1126 = vmatpush.bf16.msra.mxu3 %v1014_v19  ;;  %v1119_v60 = vld [vmem:[#allocation9 + $0x20] sm:$0xff]  ;;  %v1118_v63 = vld [vmem:[#allocation9 + $0x18] sm:$0xff]  ;;  %v1117_v2 = vld [vmem:[#allocation9 + $0x10] sm:$0xff] }
  0x24   :  { %790 = vmatpush.bf16.msra.mxu2 %v1122_v56  ;;  %v1116_v6 = vld [vmem:[#allocation9 + $0x8] sm:$0xff]  ;;  %v1115_v13 = vld [vmem:[#allocation9] sm:$0xff] }
  0x25   :  { %320 = vmatpush.bf16.msra.mxu1 %v1018_v28 }
  0x27   :  { %272 = vmatpush.bf16.msra.mxu0 %v1006_v25  ;;  %1127 = vmatpush.bf16.msra.mxu3 %v1006_v25 }
  0x28   :  { %791 = vmatpush.bf16.msra.mxu2 %v1121_v57 }
  0x29   :  { %321 = vmatpush.bf16.msra.mxu1 %v1010_v34 }
  0x2b   :  { %273 = vmatpush.bf16.msra.mxu0 %v998_v31  ;;  %1128 = vmatpush.bf16.msra.mxu3 %v998_v31 }
  0x2c   :  { %792 = vmatpush.bf16.msra.mxu2 %v1120_v58 }
  0x2d   :  { %322 = vmatpush.bf16.msra.mxu1 %v1002_v40 }
  0x2f   :  { %274 = vmatpush.bf16.msra.mxu0 %v990_v37  ;;  %1129 = vmatpush.bf16.msra.mxu3 %v990_v37 }
  0x30   :  { %793 = vmatpush.bf16.msra.mxu2 %v1119_v60 }
  0x31   :  { %323 = vmatpush.bf16.msra.mxu1 %v994_v44 }
  0x33   :  { %275 = vmatpush.bf16.msra.mxu0 %v982_v43  ;;  %1130 = vmatpush.bf16.msra.mxu3 %v982_v43 }
  0x34   :  { %794 = vmatpush.bf16.msra.mxu2 %v1118_v63 }
  0x35   :  { %324 = vmatpush.bf16.msra.mxu1 %v986_v49 }
  0x36   :  { %276 = vmatmul.bf16.vlgmr.msra.gmra.mxu0 %v1091_v47  ;;  %306 = vmatmul.bf16.vlgmr.msra.gmra.mxu3 %v1097_v48 }
  0x37   :  { %1131 = vmatpush.bf16.msrb.mxu3 %v1042_v10 }
  0x38   :  { %325 = vmatmul.bf16.vlgmr.msra.gmra.mxu1 %v1091_v47  ;;  %795 = vmatpush.bf16.msra.mxu2 %v1117_v2 }
  0x3b   :  { %1132 = vmatpush.bf16.msrb.mxu3 %v1034_v16 }
  0x3c   :  { %796 = vmatpush.bf16.msra.mxu2 %v1116_v6 }
  0x3f   :  { %1133 = vmatpush.bf16.msrb.mxu3 %v1026_v22 }
  0x40   :  { %797 = vmatpush.bf16.msra.mxu2 %v1115_v13 }
  0x43   :  { %1134 = vmatpush.bf16.msrb.mxu3 %v1018_v28 }
  0x46   :  { %281 = vmatmul.bf16.gmra.mxu0 %v1092_v50  ;;  %311 = vmatmul.bf16.gmra.mxu3 %v1098_v51 }
  0x47   :  { %1135 = vmatpush.bf16.msrb.mxu3 %v1010_v34 }
  0x48   :  { %330 = vmatmul.bf16.gmra.mxu1 %v1092_v50 }
  0x4b   :  { %1136 = vmatpush.bf16.msrb.mxu3 %v1002_v40 }
  0x4f   :  { %1137 = vmatpush.bf16.msrb.mxu3 %v994_v44 }
  0x53   :  { %1138 = vmatpush.bf16.msrb.mxu3 %v986_v49 }
  0x56   :  { %286 = vmatmul.bf16.gmra.mxu0 %v1093_v52  ;;  %355 = vmatmul.bf16.vlgmr.msrb.gmra.mxu3 %v1097_v48 }
  0x57   :  { %1139 = vmatpush.bf16.msra.mxu3 %v1122_v56 }
  0x58   :  { %335 = vmatmul.bf16.gmra.mxu1 %v1093_v52 }
  0x5b   :  { %1140 = vmatpush.bf16.msra.mxu3 %v1121_v57 }
  0x5f   :  { %1141 = vmatpush.bf16.msra.mxu3 %v1120_v58 }
  0x63   :  { %1142 = vmatpush.bf16.msra.mxu3 %v1119_v60 }
  0x66   :  { %291 = vmatmul.bf16.gmra.mxu0 %v1094_v53  ;;  %360 = vmatmul.bf16.gmra.mxu3 %v1098_v51 }
  0x67   :  { %1143 = vmatpush.bf16.msra.mxu3 %v1118_v63 }
  0x68   :  { %340 = vmatmul.bf16.gmra.mxu1 %v1094_v53 }
  0x6b   :  { %1144 = vmatpush.bf16.msra.mxu3 %v1117_v2 }
  0x6f   :  { %1145 = vmatpush.bf16.msra.mxu3 %v1116_v6 }
  0x73   :  { %1146 = vmatpush.bf16.msra.mxu3 %v1115_v13 }
  0x76   :  { %296 = vmatmul.bf16.gmra.mxu0 %v1095_v54 }
  0x78   :  { %345 = vmatmul.bf16.gmra.mxu1 %v1095_v54 }
  0x86   :  { %301 = vmatmul.bf16.gmra.mxu0 %v1096_v55 }
  0x88   :  { %350 = vmatmul.bf16.gmra.mxu1 %v1096_v55 }
  0xb3   :  { %v277_v62 = vpop.f32.mrf.mxu0 }
  0xb4   :  { %v1406_v0 = vadd.f32 %v277_v62, %v1403_v61 }
  0xb5   :  { %v1416_v9 = vpop.f32.mrf.mxu1 }
  0xb6   :  { %v1043_v1 = vmul.f32 -1.442695, %v1406_v0 }
  0xb8   :  { %1157 = vpow2.f32 %v1043_v1 }
  0xb9   :  { %v307_v3 = vpop.f32.mrf.mxu3 }
  0xba   :  { %v1410_v4 = vadd.f32 %v307_v3, %v1403_v61 }
  0xbb   :  { %v279_v5 = vpop.f32.mrf.mxu0 }
  0xbc   :  { %v1413_v7 = vadd.f32 %v279_v5, %v1403_v61  ;;  %v1055_v8 = vmul.f32 -1.442695, %v1410_v4 }
  0xbd   :  { %v1430_v23 = vpop.f32.mrf.mxu1 }
  0xbe   :  { %v1158_v10 = vpop.eup %1157  ;;  %v1044_v11 = vmul.f32 -1.442695, %v1413_v7  ;;  %1159 = vpow2.f32 %v1055_v8 }
  0xbf   :  { %v1419_v12 = vadd.f32 1.0, %v1158_v10 }
  0xc0   :  { %1161 = vpow2.f32 %v1044_v11 }
  0xc1   :  { %1163 = vrcp.f32 %v1419_v12  ;;  %v309_v14 = vpop.f32.mrf.mxu3  ;;  %v441_v28 = vand.u32 2147483648, %v1419_v12  ;;  %v439_v37 = vand.u32 2147483647, %v1419_v12  ;;  %vm435_vm0 = vweird.f32 %v1419_v12 }
  0xc2   :  { %v1423_v15 = vadd.f32 %v309_v14, %v1403_v61 }
  0xc3   :  { %v282_v16 = vpop.f32.mrf.mxu0  ;;  %v1452_v41 = vor.u32 1.1754944e-38, %v441_v28  ;;  %vm440_vm13 = vcmp.eq.f32.partialorder %v439_v37, 8.507059e+37 }
  0xc4   :  { %v1160_v17 = vpop.eup %1159  ;;  %v1426_v18 = vadd.f32 %v282_v16, %v1403_v61  ;;  %v1056_v19 = vmul.f32 -1.442695, %v1423_v15 }
  0xc5   :  { %v426_v20 = vadd.f32 1.0, %v1160_v17  ;;  %v1458_v48 = vpop.f32.mrf.mxu1 }
  0xc6   :  { %v1162_v21 = vpop.eup %1161  ;;  %v1045_v22 = vmul.f32 -1.442695, %v1426_v18  ;;  %1165 = vpow2.f32 %v1056_v19 }
  0xc7   :  { %v1432_v24 = vpop.eup %1163  ;;  %v415_v25 = vadd.f32 1.0, %v1162_v21  ;;  %1167 = vrcp.f32 %v426_v20  ;;  %v619_v46 = vand.u32 2147483647, %v426_v20  ;;  %v621_v47 = vand.u32 2147483648, %v426_v20 }
  0xc8   :  { %1169 = vpow2.f32 %v1045_v22  ;;  %v431_v26 = vmul.f32 %v1432_v24, %v1419_v12  ;;  %vm615_vm1 = vweird.f32 %v426_v20  ;;  %vm436_vm2 = vweird.f32 %v1432_v24 }
  0xc9   :  { %1171 = vrcp.f32 %v415_v25  ;;  %v312_v27 = vpop.f32.mrf.mxu3  ;;  %v454_v53 = vand.u32 2147483647, %v415_v25  ;;  %vm450_vm3 = vweird.f32 %v415_v25  ;;  %v456_v55 = vand.u32 2147483648, %v415_v25  ;;  %vm1507_vm11 = vmor %vm435_vm0, %vm436_vm2 }
  0xca   :  { %v432_v33 = vsub.f32 1.0, %v431_v26  ;;  %v1445_v35 = vadd.f32 %v312_v27, %v1403_v61  ;;  %vm1466_vm6 = vcmp.eq.f32.partialorder %v619_v46, 8.507059e+37  ;;  %v622_v59 = vor.u32 1.1754944e-38, %v621_v47 }
  0xcb   :  { %v284_v29 = vpop.f32.mrf.mxu0  ;;  %vm1479_vm7 = vcmp.eq.f32.partialorder %v454_v53, 8.507059e+37  ;;  %v457_v13 = vor.u32 1.1754944e-38, %v456_v55 }
  0xcc   :  { %v1166_v30 = vpop.eup %1165  ;;  %v1438_v31 = vadd.f32 %v284_v29, %v1403_v61  ;;  %v433_v49 = vmul.f32 %v1432_v24, %v432_v33  ;;  %v1057_v50 = vmul.f32 -1.442695, %v1445_v35 }
  0xcd   :  { %v1440_v32 = vpop.eup %1167  ;;  %v1442_v34 = vadd.f32 1.0, %v1166_v30 }
  0xce   :  { %v1170_v36 = vpop.eup %1169  ;;  %v611_v38 = vmul.f32 %v1440_v32, %v426_v20  ;;  %v1046_v43 = vmul.f32 -1.442695, %v1438_v31  ;;  %vm616_vm4 = vweird.f32 %v1440_v32  ;;  %v434_v62 = vadd.f32 %v1432_v24, %v433_v49 }
  0xcf   :  { %v1172_v40 = vpop.eup %1171  ;;  %v1454_v42 = vadd.f32 1.0, %v1170_v36  ;;  %1173 = vrcp.f32 %v1442_v34  ;;  %vm1487_vm8 = vmor %vm615_vm1, %vm616_vm4  ;;  %vm630_vm10 = vweird.f32 %v1442_v34  ;;  %v634_v21 = vand.u32 2147483647, %v1442_v34 }
  0xd0   :  { %v446_v44 = vmul.f32 %v1172_v40, %v415_v25  ;;  %v612_v45 = vsub.f32 1.0, %v611_v38  ;;  %vm451_vm5 = vweird.f32 %v1172_v40  ;;  %v636_v22 = vand.u32 2147483648, %v1442_v34  ;;  %v1528_v38 = vpop.f32.mrf.mxu1 }
  0xd1   :  { %1175 = vrcp.f32 %v1454_v42  ;;  %v314_v51 = vpop.f32.mrf.mxu3  ;;  %vm1496_vm9 = vmor %vm450_vm3, %vm451_vm5  ;;  %v438_v26 = vsel %vm1507_vm11, %v1432_v24, %v434_v62  ;;  %v327_v24 = vadd.f32 %v1416_v9, %v1449_v39  ;;  %v329_v9 = vadd.f32 %v1430_v23, %v1449_v39 }
  0xd2   :  { %v447_v52 = vsub.f32 1.0, %v446_v44  ;;  %v613_v54 = vmul.f32 %v1440_v32, %v612_v45  ;;  %1177 = vpow2.f32 %v1046_v43  ;;  %v1477_v1 = vadd.f32 %v314_v51, %v1403_v61 }
  0xd3   :  { %v287_v56 = vpop.f32.mrf.mxu0  ;;  %1179 = vpow2.f32 %v1057_v50  ;;  %v443_v45 = vsel %vm440_vm13, %v1452_v41, %v438_v26  ;;  %v637_v12 = vor.u32 1.1754944e-38, %v636_v22  ;;  %vm635_vm15 = vcmp.eq.f32.partialorder %v634_v21, 8.507059e+37 }
  0xd4   :  { %v448_v57 = vmul.f32 %v1172_v40, %v447_v52  ;;  %v1474_v63 = vadd.f32 %v287_v56, %v1403_v61  ;;  %v614_v5 = vadd.f32 %v1440_v32, %v613_v54  ;;  %v1058_v16 = vmul.f32 -1.442695, %v1477_v1 }
  0xd5   :  { %v1470_v60 = vpop.eup %1173  ;;  %v670_v23 = vmul.f32 %v443_v45, %v1406_v0  ;;  %vm465_vm0 = vweird.f32 %v1454_v42 }
  0xd6   :  { %v449_v2 = vadd.f32 %v1172_v40, %v448_v57  ;;  %v626_v8 = vmul.f32 %v1470_v60, %v1442_v34  ;;  %v1047_v14 = vmul.f32 -1.442695, %v1474_v63  ;;  %vm631_vm12 = vweird.f32 %v1470_v60 }
  0xd7   :  { %v1493_v10 = vpop.eup %1175  ;;  %v618_v33 = vsel %vm1487_vm8, %v1440_v32, %v614_v5  ;;  %vm1541_vm14 = vmor %vm630_vm10, %vm631_vm12  ;;  %v469_v34 = vand.u32 2147483647, %v1454_v42  ;;  %v686_v5 = vmul.f32 %v670_v23, %v327_v24 }
  0xd8   :  { %v453_v19 = vsel %vm1496_vm9, %v1172_v40, %v449_v2  ;;  %v461_v20 = vmul.f32 %v1493_v10, %v1454_v42  ;;  %v1178_v25 = vpop.eup %1177  ;;  %v627_v27 = vsub.f32 1.0, %v626_v8  ;;  %1181 = vpow2.f32 %v1047_v14 }
  0xd9   :  { %v356_v28 = vpop.f32.mrf.mxu3  ;;  %v458_v29 = vsel %vm1479_vm7, %v457_v13, %v453_v19  ;;  %v1526_v36 = vadd.f32 1.0, %v1178_v25  ;;  %v1180_v40 = vpop.eup %1179  ;;  %1183 = vpow2.f32 %v1058_v16  ;;  %v623_v46 = vsel %vm1466_vm6, %v622_v59, %v618_v33 }
  0xda   :  { %v462_v30 = vsub.f32 1.0, %v461_v20  ;;  %v628_v43 = vmul.f32 %v1470_v60, %v627_v27  ;;  %v671_v37 = vmul.f32 %v458_v29, %v1413_v7  ;;  %v1551_v47 = vadd.f32 1.0, %v1180_v40  ;;  %v1582_v16 = vpop.f32.mrf.mxu1 }
  0xdb   :  { %v289_v44 = vpop.f32.mrf.mxu0  ;;  %1185 = vrcp.f32 %v1526_v36  ;;  %v471_v7 = vand.u32 2147483648, %v1454_v42  ;;  %v682_v53 = vmul.f32 %v623_v46, %v1410_v4  ;;  %v357_v55 = vadd.f32 %v356_v28, %v1449_v39 }
  0xdc   :  { %v629_v41 = vadd.f32 %v1470_v60, %v628_v43  ;;  %v463_v49 = vmul.f32 %v1493_v10, %v462_v30  ;;  %v1556_v50 = vadd.f32 %v289_v44, %v1403_v61  ;;  %1187 = vrcp.f32 %v1551_v47 }
  0xdd   :  { %v486_v57 = vand.u32 2147483648, %v1526_v36  ;;  %v687_v58 = vmul.f32 %v671_v37, %v329_v9  ;;  %vm466_vm1 = vweird.f32 %v1493_v10  ;;  %vm1573_vm2 = vcmp.eq.f32.partialorder %v469_v34, 8.507059e+37 }
  0xde   :  { %v1182_v51 = vpop.eup %1181  ;;  %v633_v52 = vsel %vm1541_vm14, %v1470_v60, %v629_v41  ;;  %v1048_v59 = vmul.f32 -1.442695, %v1556_v50  ;;  %v464_v60 = vadd.f32 %v1493_v10, %v463_v49  ;;  %v472_v4 = vor.u32 1.1754944e-38, %v471_v7  ;;  %vm1588_vm4 = vmor %vm465_vm0, %vm466_vm1 }
  0xdf   :  { %v1566_v54 = vadd.f32 1.0, %v1182_v51  ;;  %v1184_v56 = vpop.eup %1183  ;;  %v638_v0 = vsel %vm635_vm15, %v637_v12, %v633_v52  ;;  %vm480_vm3 = vweird.f32 %v1526_v36  ;;  %v484_v11 = vand.u32 2147483647, %v1526_v36 }
  0xe0   :  { %v683_v13 = vmul.f32 %v638_v0, %v1423_v15  ;;  %v698_v14 = vmul.f32 %v682_v53, %v357_v55  ;;  %v487_v21 = vor.u32 1.1754944e-38, %v486_v57  ;;  %v1592_v22 = vadd.f32 1.0, %v1184_v56 }
  0xe1   :  { %v358_v62 = vpop.f32.mrf.mxu3  ;;  %v1186_v2 = vpop.eup %1185  ;;  %1189 = vrcp.f32 %v1566_v54  ;;  %v718_v25 = vpack.c.bf16 %v687_v58, %v686_v5  ;;  %v468_v15 = vsel %vm1588_vm4, %v1493_v10, %v464_v60  ;;  %vm645_vm6 = vweird.f32 %v1551_v47 }
  0xe2   :  { %v476_v6 = vmul.f32 %v1186_v2, %v1526_v36  ;;  %1191 = vpow2.f32 %v1048_v59  ;;  %v1584_v17 = vpop.eup %1187  ;;  %v359_v42 = vadd.f32 %v358_v62, %v1449_v39  ;;  %vm481_vm5 = vweird.f32 %v1186_v2  ;;  %v1645_v58 = vpop.f32.mrf.mxu1 }
  0xe3   :  { %v292_v8 = vpop.f32.mrf.mxu0  ;;  %v641_v26 = vmul.f32 %v1584_v17, %v1551_v47  ;;  %1193 = vrcp.f32 %v1592_v22  ;;  %798 = vmatmul.bf16.vlgmr.msra.gmra.mxu2 %v718_v25  ;;  %v649_v10 = vand.u32 2147483647, %v1551_v47  ;;  %v473_v24 = vsel %vm1573_vm2, %v472_v4, %v468_v15  ;;  %vm482_vm8 = vmor %vm480_vm3, %vm481_vm5 }
  0xe4   :  { %v477_v20 = vsub.f32 1.0, %v476_v6  ;;  %v1600_v27 = vadd.f32 %v292_v8, %v1403_v61  ;;  %v699_v40 = vmul.f32 %v683_v13, %v359_v42  ;;  %vm646_vm7 = vweird.f32 %v1584_v17 }
  0xe5   :  { %v642_v30 = vsub.f32 1.0, %v641_v26  ;;  %v651_v9 = vand.u32 2147483648, %v1551_v47  ;;  %vm485_vm9 = vcmp.eq.f32.partialorder %v484_v11, 8.507059e+37  ;;  %vm1626_vm10 = vmor %vm645_vm6, %vm646_vm7  ;;  %v332_v7 = vadd.f32 %v1458_v48, %v1449_v39 }
  0xe6   :  { %v478_v28 = vmul.f32 %v1186_v2, %v477_v20  ;;  %v1049_v33 = vmul.f32 -1.442695, %v1600_v27  ;;  %v724_v37 = vpack.c.bf16 %v699_v40, %v698_v14  ;;  %v334_v52 = vadd.f32 %v1528_v38, %v1449_v39 }
  0xe7   :  { %v1605_v29 = vpop.eup %1189  ;;  %v643_v12 = vmul.f32 %v1584_v17, %v642_v30  ;;  %v672_v55 = vmul.f32 %v473_v24, %v1426_v18  ;;  %vm1640_vm11 = vcmp.eq.f32.partialorder %v649_v10, 8.507059e+37  ;;  %v652_v0 = vor.u32 1.1754944e-38, %v651_v9 }
  0xe8   :  { %v479_v43 = vadd.f32 %v1186_v2, %v478_v28  ;;  %v491_v44 = vmul.f32 %v1605_v29, %v1566_v54  ;;  %v1192_v32 = vpop.eup %1191  ;;  %1195 = vpow2.f32 %v1049_v33  ;;  %828 = vmatmul.bf16.vlgmr.msra.gmra.mxu3 %v724_v37  ;;  %vm660_vm12 = vweird.f32 %v1592_v22 }
  0xe9   :  { %v361_v45 = vpop.f32.mrf.mxu3  ;;  %v1619_v49 = vadd.f32 1.0, %v1192_v32  ;;  %v644_v23 = vadd.f32 %v1584_v17, %v643_v12  ;;  %v1194_v53 = vpop.eup %1193  ;;  %v664_v60 = vand.u32 2147483647, %v1592_v22  ;;  %vm495_vm14 = vweird.f32 %v1566_v54 }
  0xea   :  { %v483_v46 = vsel %vm482_vm8, %v1186_v2, %v479_v43  ;;  %v492_v41 = vsub.f32 1.0, %v491_v44  ;;  %v656_v48 = vmul.f32 %v1194_v53, %v1592_v22  ;;  %vm661_vm13 = vweird.f32 %v1194_v53  ;;  %v1693_v37 = vpop.f32.mrf.mxu1 }
  0xeb   :  { %v294_v34 = vpop.f32.mrf.mxu0  ;;  %v488_v51 = vsel %vm485_vm9, %v487_v21, %v483_v46  ;;  %1197 = vrcp.f32 %v1619_v49  ;;  %v648_v18 = vsel %vm1626_vm10, %v1584_v17, %v644_v23  ;;  %v688_v3 = vmul.f32 %v672_v55, %v332_v7  ;;  %vm1663_vm0 = vmor %vm660_vm12, %vm661_vm13 }
  0xec   :  { %v673_v56 = vmul.f32 %v488_v51, %v1438_v31  ;;  %v1638_v47 = vadd.f32 %v294_v34, %v1403_v61  ;;  %v493_v38 = vmul.f32 %v1605_v29, %v492_v41  ;;  %v666_v31 = vand.u32 2147483648, %v1592_v22 }
  0xed   :  { %v657_v2 = vsub.f32 1.0, %v656_v48  ;;  %vm496_vm15 = vweird.f32 %v1605_v29  ;;  %v499_v6 = vand.u32 2147483647, %v1566_v54  ;;  %v653_v8 = vsel %vm1640_vm11, %v652_v0, %v648_v18 }
  0xee   :  { %v689_v59 = vmul.f32 %v673_v56, %v334_v52  ;;  %v1196_v62 = vpop.eup %1195  ;;  %v1050_v5 = vmul.f32 -1.442695, %v1638_v47  ;;  %v494_v14 = vadd.f32 %v1605_v29, %v493_v38  ;;  %v667_v19 = vor.u32 1.1754944e-38, %v666_v31  ;;  %vm1679_vm2 = vmor %vm495_vm14, %vm496_vm15 }
  0xef   :  { %v1655_v4 = vadd.f32 1.0, %v1196_v62  ;;  %v658_v11 = vmul.f32 %v1194_v53, %v657_v2  ;;  %v501_v25 = vand.u32 2147483648, %v1566_v54  ;;  %vm665_vm1 = vcmp.eq.f32.partialorder %v664_v60, 8.507059e+37 }
  0xf0   :  { %v719_v20 = vpack.c.bf16 %v689_v59, %v688_v3  ;;  %v684_v42 = vmul.f32 %v653_v8, %v1445_v35  ;;  %v362_v30 = vadd.f32 %v361_v45, %v1449_v39  ;;  %v514_v40 = vand.u32 2147483647, %v1619_v49 }
  0xf1   :  { %v1198_v13 = vpop.eup %1197  ;;  %1199 = vrcp.f32 %v1655_v4  ;;  %v363_v22 = vpop.f32.mrf.mxu3  ;;  %v659_v26 = vadd.f32 %v1194_v53, %v658_v11  ;;  %v498_v43 = vsel %vm1679_vm2, %v1605_v29, %v494_v14  ;;  %v516_v44 = vand.u32 2147483648, %v1619_v49 }
  0xf2   :  { %v506_v15 = vmul.f32 %v1198_v13, %v1619_v49  ;;  %1201 = vpow2.f32 %v1050_v5  ;;  %v364_v24 = vadd.f32 %v363_v22, %v1449_v39  ;;  %v502_v32 = vor.u32 1.1754944e-38, %v501_v25 }
  0xf3   :  { %v297_v21 = vpop.f32.mrf.mxu0  ;;  %v663_v35 = vsel %vm1663_vm0, %v1194_v53, %v659_v26  ;;  %803 = vmatmul.bf16.gmra.mxu2 %v719_v20  ;;  %vm511_vm3 = vweird.f32 %v1198_v13  ;;  %vm500_vm4 = vcmp.eq.f32.partialorder %v499_v6, 8.507059e+37  ;;  %vm510_vm5 = vweird.f32 %v1619_v49 }
  0xf4   :  { %v1672_v28 = vadd.f32 %v297_v21, %v1403_v61  ;;  %v507_v33 = vsub.f32 1.0, %v506_v15  ;;  %v668_v45 = vsel %vm665_vm1, %v667_v19, %v663_v35  ;;  %v700_v29 = vmul.f32 %v684_v42, %v362_v30  ;;  %vm512_vm6 = vmor %vm510_vm5, %vm511_vm3 }
  0xf5   :  { %v685_v9 = vmul.f32 %v668_v45, %v1477_v1  ;;  %v503_v41 = vsel %vm500_vm4, %v502_v32, %v498_v43  ;;  %vm515_vm7 = vcmp.eq.f32.partialorder %v514_v40, 8.507059e+37  ;;  %v517_v7 = vor.u32 1.1754944e-38, %v516_v44 }
  0xf6   :  { %v1051_v54 = vmul.f32 -1.442695, %v1672_v28  ;;  %v508_v12 = vmul.f32 %v1198_v13, %v507_v33  ;;  %v674_v49 = vmul.f32 %v503_v41, %v1474_v63  ;;  %v337_v0 = vadd.f32 %v1582_v16, %v1449_v39  ;;  %v343_v16 = vpop.f32.mrf.mxu1 }
  0xf7   :  { %v1695_v46 = vpop.eup %1199  ;;  %v701_v23 = vmul.f32 %v685_v9, %v364_v24  ;;  %v339_v18 = vadd.f32 %v1645_v58, %v1449_v39  ;;  %v529_v58 = vand.u32 2147483647, %v1655_v4  ;;  %v531_v8 = vand.u32 2147483648, %v1655_v4 }
  0xf8   :  { %1203 = vpow2.f32 %v1051_v54  ;;  %v509_v34 = vadd.f32 %v1198_v13, %v508_v12  ;;  %v521_v51 = vmul.f32 %v1695_v46, %v1655_v4  ;;  %v1202_v36 = vpop.eup %1201  ;;  %v690_v63 = vmul.f32 %v674_v49, %v337_v0 }
  0xf9   :  { %v421_v55 = vadd.f32 1.0, %v1202_v36  ;;  %v725_v48 = vpack.c.bf16 %v701_v23, %v700_v29  ;;  %vm526_vm8 = vweird.f32 %v1695_v46  ;;  %vm525_vm9 = vweird.f32 %v1655_v4 }
  0xfa   :  { %v513_v52 = vsel %vm512_vm6, %v1198_v13, %v509_v34  ;;  %v522_v53 = vsub.f32 1.0, %v521_v51  ;;  %vm1722_vm10 = vmor %vm525_vm9, %vm526_vm8  ;;  %vm530_vm11 = vcmp.eq.f32.partialorder %v529_v58, 8.507059e+37  ;;  %v532_v25 = vor.u32 1.1754944e-38, %v531_v8 }
  0xfb   :  { %v299_v1 = vpop.f32.mrf.mxu0  ;;  %v518_v57 = vsel %vm515_vm7, %v517_v7, %v513_v52  ;;  %1205 = vrcp.f32 %v421_v55  ;;  %833 = vmatmul.bf16.gmra.mxu3 %v725_v48  ;;  %v546_v15 = vand.u32 2147483648, %v421_v55  ;;  %v544_v42 = vand.u32 2147483647, %v421_v55 }
  0xfc   :  { %v1701_v56 = vadd.f32 %v299_v1, %v1403_v61  ;;  %v675_v38 = vmul.f32 %v518_v57, %v1556_v50  ;;  %v523_v59 = vmul.f32 %v1695_v46, %v522_v53  ;;  %vm540_vm13 = vweird.f32 %v421_v55 }
  0xfd   :  { %v547_v24 = vor.u32 1.1754944e-38, %v546_v15  ;;  %vm545_vm15 = vcmp.eq.f32.partialorder %v544_v42, 8.507059e+37  ;;  %v342_v32 = vadd.f32 %v1693_v37, %v1449_v39  ;;  %v344_v34 = vadd.f32 %v343_v16, %v1449_v39 }
  0xfe   :  { %v1204_v31 = vpop.eup %1203  ;;  %v1052_v62 = vmul.f32 -1.442695, %v1701_v56  ;;  %v691_v2 = vmul.f32 %v675_v38, %v339_v18  ;;  %v524_v50 = vadd.f32 %v1695_v46, %v523_v59  ;;  %v346_v43 = vpop.f32.mrf.mxu1 }
  0xff   :  { %v1711_v60 = vadd.f32 1.0, %v1204_v31 }
 0x100   :  { %1207 = vpow2.f32 %v1052_v62  ;;  %v720_v3 = vpack.c.bf16 %v691_v2, %v690_v63  ;;  %v528_v20 = vsel %vm1722_vm10, %v1695_v46, %v524_v50 }
 0x101   :  { %1209 = vrcp.f32 %v1711_v60  ;;  %v1206_v6 = vpop.eup %1205  ;;  %v533_v10 = vsel %vm530_vm11, %v532_v25, %v528_v20  ;;  %v561_v52 = vand.u32 2147483648, %v1711_v60  ;;  %vm555_vm1 = vweird.f32 %v1711_v60 }
 0x102   :  { %v536_v13 = vmul.f32 %v1206_v6, %v421_v55  ;;  %vm541_vm12 = vweird.f32 %v1206_v6  ;;  %v676_v45 = vmul.f32 %v533_v10, %v1600_v27 }
 0x103   :  { %v302_v5 = vpop.f32.mrf.mxu0  ;;  %808 = vmatmul.bf16.gmra.mxu2 %v720_v3  ;;  %vm542_vm14 = vmor %vm540_vm13, %vm541_vm12  ;;  %v562_v62 = vor.u32 1.1754944e-38, %v561_v52 }
 0x104   :  { %v1719_v11 = vadd.f32 %v302_v5, %v1403_v61  ;;  %v537_v21 = vsub.f32 1.0, %v536_v13  ;;  %v692_v27 = vmul.f32 %v676_v45, %v342_v32 }
 0x106   :  { %v1053_v17 = vmul.f32 -1.442695, %v1719_v11  ;;  %v1208_v19 = vpop.eup %1207  ;;  %v538_v26 = vmul.f32 %v1206_v6, %v537_v21  ;;  %v348_v48 = vpop.f32.mrf.mxu1 }
 0x107   :  { %v1730_v22 = vpop.eup %1209  ;;  %v423_v4 = vadd.f32 1.0, %v1208_v19  ;;  %v349_v8 = vadd.f32 %v348_v48, %v1449_v39 }
 0x108   :  { %1211 = vpow2.f32 %v1053_v17  ;;  %v551_v30 = vmul.f32 %v1730_v22, %v1711_v60  ;;  %v539_v33 = vadd.f32 %v1206_v6, %v538_v26  ;;  %vm556_vm0 = vweird.f32 %v1730_v22 }
 0x109   :  { %1213 = vrcp.f32 %v423_v4  ;;  %v576_v53 = vand.u32 2147483648, %v423_v4  ;;  %v574_v49 = vand.u32 2147483647, %v423_v4  ;;  %vm1752_vm3 = vmor %vm555_vm1, %vm556_vm0  ;;  %vm570_vm4 = vweird.f32 %v423_v4 }
 0x10a   :  { %v552_v40 = vsub.f32 1.0, %v551_v30  ;;  %v543_v54 = vsel %vm542_vm14, %v1206_v6, %v539_v33  ;;  %v347_v6 = vadd.f32 %v346_v43, %v1449_v39 }
 0x10b   :  { %v304_v35 = vpop.f32.mrf.mxu0  ;;  %v548_v9 = vsel %vm545_vm15, %v547_v24, %v543_v54  ;;  %v577_v2 = vor.u32 1.1754944e-38, %v576_v53  ;;  %vm575_vm7 = vcmp.eq.f32.partialorder %v574_v49, 8.507059e+37 }
 0x10c   :  { %v1735_v44 = vadd.f32 %v304_v35, %v1403_v61  ;;  %v677_v29 = vmul.f32 %v548_v9, %v1638_v47  ;;  %v553_v41 = vmul.f32 %v1730_v22, %v552_v40  ;;  %v559_v47 = vand.u32 2147483647, %v1711_v60 }
 0x10e   :  { %v1212_v12 = vpop.eup %1211  ;;  %v1054_v46 = vmul.f32 -1.442695, %v1735_v44  ;;  %v693_v36 = vmul.f32 %v677_v29, %v344_v34  ;;  %v554_v37 = vadd.f32 %v1730_v22, %v553_v41  ;;  %vm560_vm5 = vcmp.eq.f32.partialorder %v559_v47, 8.507059e+37  ;;  %v351_v20 = vpop.f32.mrf.mxu1  ;;  %v1156_v34 = vld [vmem:[%s1784_s4] ss:$0 sm:$0xff]  ;;  %s1357_s4 = smov [#allocation11]  }
 0x10f   :  { %v1744_v51 = vadd.f32 1.0, %v1212_v12  ;;  %v1214_v61 = vpop.eup %1213  ;;  %v352_v12 = vadd.f32 %v351_v20, %v1449_v39  ;;  %s930_s15 = sshll.u32 %s1357_s4, 4  ;;  %s931_s15 = int_to_ptr.vmem [resolvable:$true] %s930_s15 }
 0x110   :  { %1215 = vpow2.f32 %v1054_v46  ;;  %v566_v23 = vmul.f32 %v1214_v61, %v423_v4  ;;  %v721_v1 = vpack.c.bf16 %v693_v36, %v692_v27  ;;  %vm571_vm2 = vweird.f32 %v1214_v61 }
 0x111   :  { %1217 = vrcp.f32 %v1744_v51  ;;  %v558_v38 = vsel %vm1752_vm3, %v1730_v22, %v554_v37  ;;  %vm572_vm6 = vmor %vm570_vm4, %vm571_vm2  ;;  %vm585_vm10 = vweird.f32 %v1744_v51  ;;  %v589_v42 = vand.u32 2147483647, %v1744_v51 }
 0x112   :  { %v567_v7 = vsub.f32 1.0, %v566_v23  ;;  %v563_v16 = vsel %vm560_vm5, %v562_v62, %v558_v38 }
 0x113   :  { %813 = vmatmul.bf16.gmra.mxu2 %v721_v1  ;;  %v678_v5 = vmul.f32 %v563_v16, %v1672_v28  ;;  %vm590_vm15 = vcmp.eq.f32.partialorder %v589_v42, 8.507059e+37 }
 0x114   :  { %v568_v55 = vmul.f32 %v1214_v61, %v567_v7 }
 0x115   :  { %v694_v21 = vmul.f32 %v678_v5, %v347_v6 }
 0x116   :  { %v1216_v57 = vpop.eup %1215  ;;  %v569_v18 = vadd.f32 %v1214_v61, %v568_v55  ;;  %v353_v45 = vpop.f32.mrf.mxu1 }
 0x117   :  { %v425_v31 = vadd.f32 1.0, %v1216_v57  ;;  %v1218_v59 = vpop.eup %1217  ;;  %v354_v9 = vadd.f32 %v353_v45, %v1449_v39 }
 0x118   :  { %v573_v60 = vsel %vm572_vm6, %v1214_v61, %v569_v18  ;;  %v581_v63 = vmul.f32 %v1218_v59, %v1744_v51  ;;  %vm586_vm8 = vweird.f32 %v1218_v59 }
 0x119   :  { %1219 = vrcp.f32 %v425_v31  ;;  %v578_v50 = vsel %vm575_vm7, %v577_v2, %v573_v60  ;;  %v606_v15 = vand.u32 2147483648, %v425_v31  ;;  %v604_v28 = vand.u32 2147483647, %v425_v31  ;;  %vm587_vm11 = vmor %vm585_vm10, %vm586_vm8 }
 0x11a   :  { %v679_v58 = vmul.f32 %v578_v50, %v1701_v56  ;;  %v582_v3 = vsub.f32 1.0, %v581_v63  ;;  %v591_v56 = vand.u32 2147483648, %v1744_v51  ;;  %vm600_vm12 = vweird.f32 %v425_v31 }
 0x11b   :  { %v607_v33 = vor.u32 1.1754944e-38, %v606_v15  ;;  %vm605_vm14 = vcmp.eq.f32.partialorder %v604_v28, 8.507059e+37 }
 0x11c   :  { %v583_v14 = vmul.f32 %v1218_v59, %v582_v3  ;;  %v695_v17 = vmul.f32 %v679_v58, %v349_v8  ;;  %v592_v40 = vor.u32 1.1754944e-38, %v591_v56 }
 0x11e   :  { %v584_v25 = vadd.f32 %v1218_v59, %v583_v14  ;;  %v722_v4 = vpack.c.bf16 %v695_v17, %v694_v21 }
 0x11f   :  { %v1220_v13 = vpop.eup %1219 }
 0x120   :  { %v596_v19 = vmul.f32 %v1220_v13, %v425_v31  ;;  %vm601_vm9 = vweird.f32 %v1220_v13  ;;  %v588_v10 = vsel %vm587_vm11, %v1218_v59, %v584_v25 }
 0x121   :  { %vm602_vm13 = vmor %vm600_vm12, %vm601_vm9  ;;  %v593_v43 = vsel %vm590_vm15, %v592_v40, %v588_v10 }
 0x122   :  { %v597_v22 = vsub.f32 1.0, %v596_v19  ;;  %v680_v32 = vmul.f32 %v593_v43, %v1719_v11 }
 0x123   :  { %818 = vmatmul.bf16.gmra.mxu2 %v722_v4 }
 0x124   :  { %v598_v26 = vmul.f32 %v1220_v13, %v597_v22  ;;  %v696_v29 = vmul.f32 %v680_v32, %v352_v12 }
 0x126   :  { %v599_v30 = vadd.f32 %v1220_v13, %v598_v26 }
 0x128   :  { %v603_v35 = vsel %vm602_vm13, %v1220_v13, %v599_v30 }
 0x129   :  { %v608_v24 = vsel %vm605_vm14, %v607_v33, %v603_v35 }
 0x12a   :  { %v681_v54 = vmul.f32 %v608_v24, %v1735_v44 }
 0x12c   :  { %v697_v46 = vmul.f32 %v681_v54, %v354_v9 }
 0x12e   :  { %v723_v41 = vpack.c.bf16 %v697_v46, %v696_v29 }
 0x133   :  { %823 = vmatmul.bf16.gmra.mxu2 %v723_v41 }
 0x166   :  { %v799_v51 = vpop.f32.mrf.mxu2 }
 0x167   :  { %v894_v61 = vadd.f32 %v1156_v34, %v799_v51 }
 0x169   :  { %910 = vst [vmem:[#allocation11] sm:$0xff] %v894_v61 }
 0x16b   :  { %v829_v27 = vpop.f32.mrf.mxu3 }
 0x16c   :  { %v906_v23 = vadd.f32 %v1156_v34, %v829_v27 }
 0x16e   :  { %v801_v44 = vpop.f32.mrf.mxu2  ;;  %922 = vst [vmem:[#allocation11 + $0x60] sm:$0xff] %v906_v23 }
 0x16f   :  { %v895_v11 = vadd.f32 %v1156_v34, %v801_v44 }
 0x171   :  { %911 = vst [vmem:[#allocation11 + $0x8] sm:$0xff] %v895_v11 }
 0x173   :  { %v831_v36 = vpop.f32.mrf.mxu3 }
 0x174   :  { %v907_v37 = vadd.f32 %v1156_v34, %v831_v36 }
 0x176   :  { %v804_v39 = vpop.f32.mrf.mxu2  ;;  %923 = vst [vmem:[#allocation11 + $0x68] sm:$0xff] %v907_v37 }
 0x177   :  { %v896_v7 = vadd.f32 %v1156_v34, %v804_v39 }
 0x179   :  { %912 = vst [vmem:[#allocation11 + $0x10] sm:$0xff] %v896_v7 }
 0x17e   :  { %v806_v1 = vpop.f32.mrf.mxu2  ;;  %v834_v47 = vpop.f32.mrf.mxu3 }
 0x17f   :  { %v897_v52 = vadd.f32 %v1156_v34, %v806_v1  ;;  %v908_v53 = vadd.f32 %v1156_v34, %v834_v47 }
 0x181   :  { %913 = vst [vmem:[#allocation11 + $0x18] sm:$0xff] %v897_v52 }
 0x182   :  { %924 = vst [vmem:[#allocation11 + $0x70] sm:$0xff] %v908_v53 }
 0x186   :  { %v809_v55 = vpop.f32.mrf.mxu2  ;;  %v836_v49 = vpop.f32.mrf.mxu3 }
 0x187   :  { %v898_v57 = vadd.f32 %v1156_v34, %v809_v55  ;;  %v909_v0 = vadd.f32 %v1156_v34, %v836_v49 }
 0x189   :  { %914 = vst [vmem:[#allocation11 + $0x20] sm:$0xff] %v898_v57 }
 0x18a   :  { %925 = vst [vmem:[#allocation11 + $0x78] sm:$0xff] %v909_v0 }
 0x18e   :  { %v811_v48 = vpop.f32.mrf.mxu2 }
 0x18f   :  { %v899_v38 = vadd.f32 %v1156_v34, %v811_v48 }
 0x191   :  { %915 = vst [vmem:[#allocation11 + $0x28] sm:$0xff] %v899_v38 }
 0x196   :  { %v814_v18 = vpop.f32.mrf.mxu2 }
 0x197   :  { %v900_v31 = vadd.f32 %v1156_v34, %v814_v18 }
 0x199   :  { %916 = vst [vmem:[#allocation11 + $0x30] sm:$0xff] %v900_v31 }
 0x19e   :  { %v816_v59 = vpop.f32.mrf.mxu2 }
 0x19f   :  { %v901_v62 = vadd.f32 %v1156_v34, %v816_v59 }
 0x1a1   :  { %917 = vst [vmem:[#allocation11 + $0x38] sm:$0xff] %v901_v62 }
 0x1a6   :  { %v819_v2 = vpop.f32.mrf.mxu2 }
 0x1a7   :  { %v902_v60 = vadd.f32 %v1156_v34, %v819_v2 }
 0x1a9   :  { %918 = vst [vmem:[#allocation11 + $0x40] sm:$0xff] %v902_v60 }
 0x1ae   :  { %v821_v63 = vpop.f32.mrf.mxu2 }
 0x1af   :  { %v903_v16 = vadd.f32 %v1156_v34, %v821_v63 }
 0x1b1   :  { %919 = vst [vmem:[#allocation11 + $0x48] sm:$0xff] %v903_v16 }
 0x1b6   :  { %v824_v50 = vpop.f32.mrf.mxu2 }
 0x1b7   :  { %v904_v58 = vadd.f32 %v1156_v34, %v824_v50 }
 0x1b9   :  { %920 = vst [vmem:[#allocation11 + $0x50] sm:$0xff] %v904_v58 }
 0x1be   :  { %v826_v3 = vpop.f32.mrf.mxu2 }
 0x1bf   :  { %v905_v5 = vadd.f32 %v1156_v34, %v826_v3 }
 0x1c1   :  { %921 = vst [vmem:[#allocation11 + $0x58] sm:$0xff] %v905_v5 }
 0x1c2   :  { %938 = dma.vmem_to_hbm [thread:$0]  %s931_s15, 2048, %s933_s18, [#allocation5], %s1350_s26, %s1350_s26, %s1351_s27  }
 0x1c3   :  { %1347 = dma.done.wait [#allocation5], 2048  }
 0x1c4   :  { %1348 = vsyncadd [#allocation5], 4294965248 }
 0x1c5   :  { %943 = vsyncpa [#allocation4], 1 }
 0x1c6   :  { %944 = vsyncpa [#allocation7], 1 }
 0x1c7   :  { %945 = vsyncpa [#allocation10], 1 }
 0x1c8   :  { %946 = vsyncpa [#allocation5], 1 }

</bundles_post_ra>
